<compile_context>
chip_gen: v7x
topology: tpu7x:2x2x1
jax: 0.10.0
libtpu: 0.0.40
codegen_flags: <defaults>
</compile_context>

<pallas_src>
import jax
import jax.numpy as jnp
from jax.experimental import pallas as pl
from jax.experimental.pallas import tpu as pltpu

EPS = 1e-5
NEG_SLOPE = 0.1
_VMEM_LIMIT = 32 * 1024 * 1024  # conservative: fits v7x (64 MiB phys) as well as v5e/v6e


def _mask_cols(v, i, m_tile, m_valid):
    """Zero lane columns beyond the true M extent (zero-padded tail)."""
    col = i * m_tile + jax.lax.broadcasted_iota(jnp.int32, (1, m_tile), 1)
    return jnp.where(col < m_valid, v, 0.0)


def _make_conv_stats_kernel(m_valid, m_tile, needs_mask):
    """Pass 1: conv1 = W1 @ patches (lane-dense), accumulate sum / sumsq over M."""

    def kernel(p_ref, w_ref, conv_ref, sum_ref, ssq_ref):
        i = pl.program_id(0)
        conv = jnp.dot(w_ref[...], p_ref[...], preferred_element_type=jnp.float32)
        conv_ref[...] = conv

        @pl.when(i == 0)
        def _init():
            sum_ref[...] = jnp.zeros_like(sum_ref)
            ssq_ref[...] = jnp.zeros_like(ssq_ref)

        v = _mask_cols(conv, i, m_tile, m_valid) if needs_mask else conv
        sum_ref[...] += jnp.sum(v, axis=1, keepdims=True)
        ssq_ref[...] += jnp.sum(v * v, axis=1, keepdims=True)

    return kernel


def _make_bn_lrelu_conv_stats_kernel(m_valid, m_tile, needs_mask):
    """Pass 2: BN1 (folded scale/shift) + LeakyReLU, fused with the 1x1 conv2
    matmul and conv2's per-channel stats. Block-1 activations stay in VMEM."""
    inv_m = 1.0 / float(m_valid)

    def kernel(conv1_ref, sum1_ref, ssq1_ref, g1_ref, beta1_ref, w2_ref,
               conv2_ref, sum2_ref, ssq2_ref):
        i = pl.program_id(0)
        mean1 = sum1_ref[...] * inv_m                       # (OC1, 1)
        var1 = ssq1_ref[...] * inv_m - mean1 * mean1        # biased var (PyTorch fwd)
        scale1 = g1_ref[...] * jax.lax.rsqrt(var1 + EPS)    # folded BN affine
        shift1 = beta1_ref[...] - mean1 * scale1
        y1 = conv1_ref[...] * scale1 + shift1               # one FMA per element
        a1 = jnp.where(y1 > 0, y1, NEG_SLOPE * y1)          # LeakyReLU(0.1)

        conv2 = jnp.dot(w2_ref[...], a1, preferred_element_type=jnp.float32)
        conv2_ref[...] = conv2

        @pl.when(i == 0)
        def _init():
            sum2_ref[...] = jnp.zeros_like(sum2_ref)
            ssq2_ref[...] = jnp.zeros_like(ssq2_ref)

        v = _mask_cols(conv2, i, m_tile, m_valid) if needs_mask else conv2
        sum2_ref[...] += jnp.sum(v, axis=1, keepdims=True)
        ssq2_ref[...] += jnp.sum(v * v, axis=1, keepdims=True)

    return kernel


def _make_bn_lrelu_kernel(m_valid):
    """Pass 3: BN2 (folded scale/shift) + LeakyReLU over lane-dense M tiles."""
    inv_m = 1.0 / float(m_valid)

    def kernel(conv_ref, sum_ref, ssq_ref, g_ref, beta_ref, o_ref):
        mean = sum_ref[...] * inv_m
        var = ssq_ref[...] * inv_m - mean * mean
        scale = g_ref[...] * jax.lax.rsqrt(var + EPS)
        shift = beta_ref[...] - mean * scale
        y = conv_ref[...] * scale + shift
        o_ref[...] = jnp.where(y > 0, y, NEG_SLOPE * y)

    return kernel


def _im2col_3x3_cmajor(x_nchw):
    """NCHW -> (C*9, N*H*W) patches for a 3x3 / stride-1 / pad-1 conv.

    Channel-major: only leading (non-lane) axes are permuted; H and W stay as
    the trailing (sublane, lane) axes, and the final reshape is a pure bitcast.
    """
    n, c, h, w = x_nchw.shape
    x_t = jnp.transpose(x_nchw, (1, 0, 2, 3))               # (C, N, H, W)
    x_pad = jnp.pad(x_t, ((0, 0), (0, 0), (1, 1), (1, 1)))  # (C, N, H+2, W+2)
    slices = [x_pad[:, :, i:i + h, j:j + w] for i in range(3) for j in range(3)]
    patches = jnp.stack(slices, axis=1)                     # (C, 9, N, H, W)
    return patches.reshape(c * 9, n * h * w)                # (K1, M) — bitcast


def scaled_prediction_forward(x, conv_w1, conv_b1, bn_g1, bn_b1,
                              conv_w2, conv_b2, bn_g2, bn_b2,
                              nclasses, *, m_tile=512):
    """Full ScaledPrediction forward. x: NCHW float32.

    conv biases are accepted for API parity with nn.Conv2d but are exact no-ops
    under training-mode BatchNorm (mean-centering removes them), so unused.
    """
    del conv_b1, conv_b2  # mathematically cancelled by BN mean-centering

    n, c, h, w = x.shape
    oc1 = conv_w1.shape[0]
    oc2 = conv_w2.shape[0]
    assert oc2 == 3 * (nclasses + 5), (oc2, nclasses)
    k1 = c * 9
    m = n * h * w
    f32 = jnp.float32

    patches = _im2col_3x3_cmajor(x.astype(f32))             # (K1, M)
    w1_2d = conv_w1.reshape(oc1, k1).astype(f32)            # (OC1, K1)
    w2_2d = conv_w2.reshape(oc2, oc1).astype(f32)           # (OC2, OC1)  (1x1 conv)
    g1 = bn_g1.reshape(oc1, 1).astype(f32)
    b1 = bn_b1.reshape(oc1, 1).astype(f32)
    g2 = bn_g2.reshape(oc2, 1).astype(f32)
    b2 = bn_b2.reshape(oc2, 1).astype(f32)

    # --- M tiling: M sits on the 128-wide lane axis; tiles are (8,128)-aligned.
    mt = max(128, (min(m_tile, m) + 127) // 128 * 128)
    mp = pl.cdiv(m, mt) * mt
    needs_mask = mp != m
    if needs_mask:
        # Zero-padded columns contribute exactly 0 to the (bias-free) conv,
        # and are additionally masked out of the stats accumulators.
        patches = jnp.pad(patches, ((0, 0), (0, mp - m)))
    grid = (mp // mt,)

    def tile_spec(rows):   # lane-dense (rows, m_tile) block, walks M with the grid
        return pl.BlockSpec((rows, mt), lambda i: (0, i))

    def vec_spec(rows):    # per-channel (rows, 1) block, resident across the grid
        return pl.BlockSpec((rows, 1), lambda i: (0, 0))

    def full_spec(shape):  # whole small array, resident
        return pl.BlockSpec(shape, lambda i: (0, 0))

    reduce_params = pltpu.CompilerParams(
        dimension_semantics=("arbitrary",), vmem_limit_bytes=_VMEM_LIMIT)
    parallel_params = pltpu.CompilerParams(
        dimension_semantics=("parallel",), vmem_limit_bytes=_VMEM_LIMIT)

    # Pass 1: conv1 + BN1 statistics (resident accumulators across M tiles).
    conv1, sum1, ssq1 = pl.pallas_call(
        _make_conv_stats_kernel(m, mt, needs_mask),
        grid=grid,
        in_specs=[tile_spec(k1), full_spec((oc1, k1))],
        out_specs=[tile_spec(oc1), vec_spec(oc1), vec_spec(oc1)],
        out_shape=(jax.ShapeDtypeStruct((oc1, mp), f32),
                   jax.ShapeDtypeStruct((oc1, 1), f32),
                   jax.ShapeDtypeStruct((oc1, 1), f32)),
        compiler_params=reduce_params,
    )(patches, w1_2d)

    # Pass 2: BN1 + LeakyReLU fused with conv2 (1x1) + BN2 statistics.
    conv2, sum2, ssq2 = pl.pallas_call(
        _make_bn_lrelu_conv_stats_kernel(m, mt, needs_mask),
        grid=grid,
        in_specs=[tile_spec(oc1), vec_spec(oc1), vec_spec(oc1),
                  vec_spec(oc1), vec_spec(oc1), full_spec((oc2, oc1))],
        out_specs=[tile_spec(oc2), vec_spec(oc2), vec_spec(oc2)],
        out_shape=(jax.ShapeDtypeStruct((oc2, mp), f32),
                   jax.ShapeDtypeStruct((oc2, 1), f32),
                   jax.ShapeDtypeStruct((oc2, 1), f32)),
        compiler_params=reduce_params,
    )(conv1, sum1, ssq1, g1, b1, w2_2d)

    # Pass 3: BN2 + LeakyReLU (independent M tiles -> "parallel" for v7x megacore).
    y2 = pl.pallas_call(
        _make_bn_lrelu_kernel(m),
        grid=grid,
        in_specs=[tile_spec(oc2), vec_spec(oc2), vec_spec(oc2),
                  vec_spec(oc2), vec_spec(oc2)],
        out_specs=tile_spec(oc2),
        out_shape=jax.ShapeDtypeStruct((oc2, mp), f32),
        compiler_params=parallel_params,
    )(conv2, sum2, ssq2, g2, b2)

    # (OC2, Mp) -> (3, nc+5, N, H, W) -> (N, 3, H, W, nc+5)   (module's reshape+permute)
    y2 = y2[:, :m].reshape(3, nclasses + 5, n, h, w)
    return jnp.transpose(y2, (2, 0, 3, 4, 1))


def _reference(x, w1, b1, g1, beta1, w2, b2, g2, beta2, nclasses):
    """Plain-JAX replica of the PyTorch module (training-mode BN, with conv bias)."""
    def cnn_block(inp, wt, bias, gamma, beta, pad):
        out = jax.lax.conv_general_dilated(
            inp, wt, window_strides=(1, 1),
            padding=[(pad, pad), (pad, pad)],
            dimension_numbers=("NCHW", "OIHW", "NCHW"),
        ) + bias.reshape(1, -1, 1, 1)
        mean = jnp.mean(out, axis=(0, 2, 3), keepdims=True)
        var = jnp.mean((out - mean) ** 2, axis=(0, 2, 3), keepdims=True)
        y = (out - mean) * jax.lax.rsqrt(var + EPS)
        y = y * gamma.reshape(1, -1, 1, 1) + beta.reshape(1, -1, 1, 1)
        return jnp.where(y > 0, y, NEG_SLOPE * y)

    out = cnn_block(x, w1, b1, g1, beta1, pad=1)
    out = cnn_block(out, w2, b2, g2, beta2, pad=0)
    n, _, h, w = x.shape
    out = out.reshape(n, 3, nclasses + 5, h, w)
    return jnp.transpose(out, (0, 1, 3, 4, 2))


if __name__ == "__main__":
    # ScaledPrediction(channels=4, nclasses=3): block1 4->8 (k3,p1), block2 8->24 (k1,p0)
    CHANNELS, NCLASSES = 4, 3
    N, H, W = 2, 16, 16
    OC1 = CHANNELS * 2
    OC2 = (NCLASSES + 5) * 3

    key = jax.random.PRNGKey(0)
    ks = jax.random.split(key, 9)
    x = jax.random.normal(ks[0], (N, CHANNELS, H, W), dtype=jnp.float32)
    conv_w1 = jax.random.normal(ks[1], (OC1, CHANNELS, 3, 3), dtype=jnp.float32) * 0.1
    conv_b1 = jax.random.normal(ks[2], (OC1,), dtype=jnp.float32) * 0.1
    bn_g1 = 1.0 + 0.1 * jax.random.normal(ks[3], (OC1,), dtype=jnp.float32)
    bn_b1 = 0.1 * jax.random.normal(ks[4], (OC1,), dtype=jnp.float32)
    conv_w2 = jax.random.normal(ks[5], (OC2, OC1, 1, 1), dtype=jnp.float32) * 0.1
    conv_b2 = jax.random.normal(ks[6], (OC2,), dtype=jnp.float32) * 0.1
    bn_g2 = 1.0 + 0.1 * jax.random.normal(ks[7], (OC2,), dtype=jnp.float32)
    bn_b2 = 0.1 * jax.random.normal(ks[8], (OC2,), dtype=jnp.float32)

    # m_tile=256 -> M=512 splits into a 2-step grid, exercising the tiled
    # stats-accumulation path (use 512-1024 for production shapes).
    out = scaled_prediction_forward(
        x, conv_w1, conv_b1, bn_g1, bn_b1,
        conv_w2, conv_b2, bn_g2, bn_b2,
        NCLASSES, m_tile=256)
    out = jax.block_until_ready(out)

    ref = _reference(x, conv_w1, conv_b1, bn_g1, bn_b1,
                     conv_w2, conv_b2, bn_g2, bn_b2, NCLASSES)
    assert out.shape == (N, 3, H, W, NCLASSES + 5), out.shape
    assert jnp.allclose(out, ref, atol=1e-3, rtol=1e-3), "mismatch vs reference"

    print("KERNEL_OK")
</pallas_src>

<mosaic_0001>
module attributes {stable_mosaic.version = 11 : i64} {
  func.func @kernel(%arg0: i32, %arg1: memref<36x256xf32, #tpu.memory_space<vmem>>, %arg2: memref<8x36xf32, #tpu.memory_space<vmem>>, %arg3: memref<8x256xf32, #tpu.memory_space<vmem>>, %arg4: memref<8x1xf32, #tpu.memory_space<vmem>>, %arg5: memref<8x1xf32, #tpu.memory_space<vmem>>) attributes {dimension_semantics = [#tpu.dimension_semantics<arbitrary>], iteration_bounds = array<i64: 2>, scalar_prefetch = 0 : i64, scratch_operands = 0 : i64, tpu.core_type = #tpu.core_type<tc>, window_params = [{transform_indices = @transform_0, window_bounds = array<i64: 36, 256>}, {pipeline_mode = #tpu.pipeline_mode<synchronous>, transform_indices = @transform_1, window_bounds = array<i64: 8, 36>}, {transform_indices = @transform_2, window_bounds = array<i64: 8, 256>}, {pipeline_mode = #tpu.pipeline_mode<synchronous>, transform_indices = @transform_3, window_bounds = array<i64: 8, 1>}, {pipeline_mode = #tpu.pipeline_mode<synchronous>, transform_indices = @transform_4, window_bounds = array<i64: 8, 1>}]} {
    %c0 = arith.constant 0 : index
    %c0_0 = arith.constant 0 : index
    %0 = vector.load %arg2[%c0, %c0_0] : memref<8x36xf32, #tpu.memory_space<vmem>>, vector<8x36xf32>
    %c0_1 = arith.constant 0 : index
    %c0_2 = arith.constant 0 : index
    %1 = vector.load %arg1[%c0_1, %c0_2] : memref<36x256xf32, #tpu.memory_space<vmem>>, vector<36x256xf32>
    %cst = arith.constant dense<0.000000e+00> : vector<8x256xf32>
    %2 = tpu.matmul %0, %1, %cst {dimension_numbers = #tpu.dot_dimension_numbers<[1], [0], [0], [1], [0, 0, 1, 1], [], []>} : vector<8x36xf32>, vector<36x256xf32>, vector<8x256xf32> -> vector<8x256xf32>
    %c0_3 = arith.constant 0 : index
    %c0_4 = arith.constant 0 : index
    %3 = vector.load %arg3[%c0_3, %c0_4] : memref<8x256xf32, #tpu.memory_space<vmem>>, vector<8x256xf32>
    tpu.vector_store %arg3[%c0_3, %c0_4], %2 {strides = array<i32>} : memref<8x256xf32, #tpu.memory_space<vmem>>, vector<8x256xf32>,
    %c0_i32 = arith.constant 0 : i32
    %4 = arith.cmpi eq, %arg0, %c0_i32 : i32
    %5 = arith.extui %4 : i1 to i32
    %c0_i32_5 = arith.constant 0 : i32
    %6 = arith.cmpi ne, %5, %c0_i32_5 : i32
    scf.if %6 {
      %cst_16 = arith.constant 0.000000e+00 : f32
      %18 = vector.broadcast %cst_16 : f32 to vector<8x1xf32>
      %c0_17 = arith.constant 0 : index
      %c0_18 = arith.constant 0 : index
      %19 = vector.load %arg4[%c0_17, %c0_18] : memref<8x1xf32, #tpu.memory_space<vmem>>, vector<8x1xf32>
      tpu.vector_store %arg4[%c0_17, %c0_18], %18 {strides = array<i32>} : memref<8x1xf32, #tpu.memory_space<vmem>>, vector<8x1xf32>,
      %cst_19 = arith.constant 0.000000e+00 : f32
      %20 = vector.broadcast %cst_19 : f32 to vector<8x1xf32>
      %c0_20 = arith.constant 0 : index
      %c0_21 = arith.constant 0 : index
      %21 = vector.load %arg5[%c0_20, %c0_21] : memref<8x1xf32, #tpu.memory_space<vmem>>, vector<8x1xf32>
      tpu.vector_store %arg5[%c0_20, %c0_21], %20 {strides = array<i32>} : memref<8x1xf32, #tpu.memory_space<vmem>>, vector<8x1xf32>,
    } else {
    }
    %c0_6 = arith.constant 0 : index
    %c0_7 = arith.constant 0 : index
    %7 = vector.load %arg4[%c0_6, %c0_7] : memref<8x1xf32, #tpu.memory_space<vmem>>, vector<8x1xf32>
    %cst_8 = arith.constant dense<0.000000e+00> : vector<8xf32>
    %8 = vector.multi_reduction <add>, %2, %cst_8 [1] : vector<8x256xf32> to vector<8xf32>
    %9 = vector.shape_cast %8 : vector<8xf32> to vector<8x1xf32>
    %10 = arith.addf %7, %9 : vector<8x1xf32>
    %c0_9 = arith.constant 0 : index
    %c0_10 = arith.constant 0 : index
    %11 = vector.load %arg4[%c0_9, %c0_10] : memref<8x1xf32, #tpu.memory_space<vmem>>, vector<8x1xf32>
    tpu.vector_store %arg4[%c0_9, %c0_10], %10 {strides = array<i32>} : memref<8x1xf32, #tpu.memory_space<vmem>>, vector<8x1xf32>,
    %c0_11 = arith.constant 0 : index
    %c0_12 = arith.constant 0 : index
    %12 = vector.load %arg5[%c0_11, %c0_12] : memref<8x1xf32, #tpu.memory_space<vmem>>, vector<8x1xf32>
    %13 = arith.mulf %2, %2 : vector<8x256xf32>
    %cst_13 = arith.constant dense<0.000000e+00> : vector<8xf32>
    %14 = vector.multi_reduction <add>, %13, %cst_13 [1] : vector<8x256xf32> to vector<8xf32>
    %15 = vector.shape_cast %14 : vector<8xf32> to vector<8x1xf32>
    %16 = arith.addf %12, %15 : vector<8x1xf32>
    %c0_14 = arith.constant 0 : index
    %c0_15 = arith.constant 0 : index
    %17 = vector.load %arg5[%c0_14, %c0_15] : memref<8x1xf32, #tpu.memory_space<vmem>>, vector<8x1xf32>
    tpu.vector_store %arg5[%c0_14, %c0_15], %16 {strides = array<i32>} : memref<8x1xf32, #tpu.memory_space<vmem>>, vector<8x1xf32>,
    return
  }
  func.func @transform_0(%arg0: i32) -> (i32, i32) {
    %c0_i32 = arith.constant 0 : i32
    %c0_i32_0 = arith.constant 0 : i32
    return %c0_i32, %arg0 : i32, i32
  }
  func.func @transform_1(%arg0: i32) -> (i32, i32) {
    %c0_i32 = arith.constant 0 : i32
    %c0_i32_0 = arith.constant 0 : i32
    %c0_i32_1 = arith.constant 0 : i32
    return %c0_i32, %c0_i32_0 : i32, i32
  }
  func.func @transform_2(%arg0: i32) -> (i32, i32) {
    %c0_i32 = arith.constant 0 : i32
    %c0_i32_0 = arith.constant 0 : i32
    return %c0_i32, %arg0 : i32, i32
  }
  func.func @transform_3(%arg0: i32) -> (i32, i32) {
    %c0_i32 = arith.constant 0 : i32
    %c0_i32_0 = arith.constant 0 : i32
    %c0_i32_1 = arith.constant 0 : i32
    return %c0_i32, %c0_i32_0 : i32, i32
  }
  func.func @transform_4(%arg0: i32) -> (i32, i32) {
    %c0_i32 = arith.constant 0 : i32
    %c0_i32_0 = arith.constant 0 : i32
    %c0_i32_1 = arith.constant 0 : i32
    return %c0_i32, %c0_i32_0 : i32, i32
  }
}

</mosaic_0001>

<bundles_post_ra>
// kernel: tpu_custom_call.1
= control target key start
LH: loop header
LB: loop body
LE: loop exit
PB: predicated region body
PF: predicated region fallthrough
CT: control target
= control target key end

     0   :  { %10 = vsyncpa [#allocation3], 0  ;;  %s917_s0 = inlined_call_operand.hbm [shape: f32[36,512], index: 0, kind: input, shape index: {}]   ;;  %s918_s1 = inlined_call_operand.hbm [shape: f32[8,36], index: 1, kind: input, shape index: {}]   ;;  %s919_s2 = inlined_call_operand.hbm [shape: f32[8,512], index: 2, kind: output, shape index: {0}]   ;;  %s920_s3 = inlined_call_operand.vmem [shape: f32[8,1], index: 3, kind: output, shape index: {1}]   ;;  %s921_s4 = inlined_call_operand.vmem [shape: f32[8,1], index: 4, kind: output, shape index: {2}]  }
   0x1   :  { %12 = vsyncpa [#allocation3 + $0x1], 0 }
   0x2   :  { %13 = vsyncpa [#allocation6], 0 }
   0x3   :  { %14 = vsyncpa [#allocation4], 0 }
   0x4   :  { %16 = vsyncpa [#allocation4 + $0x1], 0  ;;  %s705_s15 = smov 0   ;;  %s707_s16 = smov 0  }
   0x5   :  { %s709_s17 = smov 0   ;;  %s711_s18 = smov 0  }
   0x6 LB: > { %s726_s19 = sadd.s32 4294967295, %s670_s18   ;;  %s450_s20 = sadd.s32 4294967294, %s670_s18   ;;  %s670_s18 = sphi %s711_s18, %s947_s18   ;;  %s666_s17 = sphi %s709_s17, %s946_s17   ;;  %s662_s16 = sphi %s707_s16, %s945_s16   ;;  %s658_s15 = sphi %s705_s15, %s944_s15  }
   0x7   : > { %s730_s21 = sadd.s32 1, %s670_s18   ;;  %s29_s22 = sadd.s32 1, %s666_s17 }
   0x8   : > { %s26_s23 = ssub.s32 %s670_s18, %s730_s21  ;;  %p36_p0 = scmp.ne.s32.totalorder %s666_s17, %s662_s16 }
   0x9   : > { %p27_p1 = scmp.eq.s32.totalorder %s26_s23, 0  ;;  %p37_p2 = scmp.eq.s32.totalorder %s670_s18, 0 }
   0xa   : > { %p42_p3 = scmp.ne.s32.totalorder %s662_s16, %s658_s15  ;;  %p922_p4 = scmp.eq.s32.totalorder %s726_s19, 0 }
   0xb   : > { %s742_s24 = scalar_select %p27_p1, %s666_s17, %s29_s22  }
   0xc   : > { %p744_p5 = por %p37_p2, %p36_p0  ;;  %p750_p6 = por %p922_p4, %p42_p3 }
   0xd   : > { %p87_p7 = scmp.eq.s32.totalorder %s726_s19, 1  ;;  %p93_p8 = scmp.eq.s32.totalorder %s450_s20, 1 }
   0xe   : > { %s928_s26 = scalar_select %p750_p6, 1, 0 }
   0xf   : > { %p451_p9 = scmp.ge.s32.totalorder %s670_s18, 1  ;;  %p142_p10 = scmp.lt.s32.totalorder %s670_s18, 3 }
  0x10   : > { %p757_p11 = por %p87_p7, %p36_p0  ;;  %p761_p12 = por %p93_p8, %p42_p3 }
  0x11   : > { %p765_p13 = pnand %p451_p9, %p142_p10  ;;  %s672_s30 = smov [#allocation5]  }
  0x12   : > { %s929_s27 = scalar_select %p757_p11, 1, 0 }
  0x13   : > { %s930_s28 = scalar_select %p761_p12, 1, 0 }
  0x14   : > { %s931_s29 = scalar_select %p765_p13, 1, 0 }
  0x15   : > { %p488_p4 = pneg %p765_p13  ;;  %s155_s5 = sshll.u32 %s672_s30, 4  ;;  %s156_s5 = int_to_ptr.vmem [resolvable:$true] %s155_s5 }
  0x16   : > { %p501_p0 = scmp.lt.s32.totalorder %s670_s18, 2  ;;  %p932_p7 = scmp.eq.s32.totalorder %s726_s19, 0 }
  0x17   : > { %s166_s7 = sand.u32 1, %s666_s17   ;;  %s542_s12 = scalar_lea.hbm %s918_s1, 128 }
  0x18   : > { %p776_p6 = pnand %p488_p4, %p932_p7  ;;  %p783_p3 = pnand %p501_p0, %p744_p5 }
  0x19   : > { %s478_s9 = smul.u32 80, %s166_s7  ;;  %p543_p8 = scmp.ne.s32.totalorder %s918_s1, %s542_s12 }
  0x1a   : > { %s934_s8 = scalar_select %p783_p3, 1, 0 }
  0x1b   : > { %p544_p4 = pneg %p776_p6  ;;  %p549_p5 = scmp.lt.u32.totalorder %s542_s12, %s918_s1 }
  0x1d   : > { %p545_p9 = pnand %p544_p4, %p543_p8 }
  0x1f   : > { %p546_p10 = pneg %p545_p9 }
  0x21   : > { %p551_p0 = pnand %p549_p5, %p546_p10 }
  0x23   : > { %554 = shalt.err (!%p551_p0)
}
  0x24   : > { %s555_s23 = scalar_lea.vmem %s156_s5, 128  ;;  %p563_p12 = scmp.lt.s32.totalorder %s156_s5, %s156_s5 }
  0x25   : > { %p556_p7 = scmp.ne.s32.totalorder %s156_s5, %s555_s23  ;;  %p564_p11 = scmp.lt.s32.totalorder %s555_s23, %s555_s23 }
  0x27   : > { %p558_p2 = pnand %p556_p7, %p544_p4  ;;  %p565_p13 = por %p564_p11, %p563_p12 }
  0x29   : > { %p559_p1 = pneg %p558_p2 }
  0x2b   : > { %p566_p3 = pnand %p565_p13, %p559_p1 }
  0x2d   : > { %569 = shalt.err (!%p566_p3)
}
  0x2e   : > { %491 = dma.hbm_to_vmem [thread:$0]  (!%p776_p6), %s918_s1, 128, %s156_s5, [#allocation6]  }
  0x2f   : > { %s468_s10 = sshll.u32 %s670_s18, 8  ;;  %s170_s11 = scalar_lea.vmem [#allocation2], %s478_s9 }
  0x30   : > { %s177_s12 = sshll.u32 %s170_s11, 4  ;;  %s807_s20 = scalar_lea.hbm %s917_s0, %s468_s10  ;;  %s809_s12 = int_to_ptr.vmem [resolvable:$true] %s177_s12 }
  0x31   : > { %s811_s6 = scalar_lea.sflag [#allocation3], %s166_s7  ;;  %s570_s22 = scalar_lea.hbm %s807_s20, 1280 }
  0x32   : > { %p571_p11 = scmp.ne.s32.totalorder %s807_s20, %s570_s22  ;;  %p935_p12 = scmp.ne.s32.totalorder %s934_s8, 0 }
  0x33   : > { %s575_s23 = scalar_lea.hbm %s917_s0, 2560  ;;  %p576_p2 = scmp.lt.u32.totalorder %s807_s20, %s917_s0 }
  0x34   : > { %p572_p6 = pneg %p935_p12  ;;  %p577_p3 = scmp.lt.u32.totalorder %s575_s23, %s570_s22 }
  0x35   : > { %p579_p4 = scmp.lt.u32.totalorder %s570_s22, %s807_s20 }
  0x36   : > { %p573_p13 = pnand %p572_p6, %p571_p11  ;;  %p578_p8 = por %p577_p3, %p576_p2 }
  0x38   : > { %p574_p1 = pneg %p573_p13  ;;  %p580_p9 = por %p579_p4, %p578_p8 }
  0x3a   : > { %p581_p10 = pnand %p580_p9, %p574_p1 }
  0x3c   : > { %584 = shalt.err (!%p581_p10)
}
  0x3d   : > { %s585_s7 = scalar_lea.vmem %s809_s12, 1280  ;;  %s673_s10 = smov [#allocation2]  }
  0x3e   : > { %p586_p5 = scmp.ne.s32.totalorder %s809_s12, %s585_s7  ;;  %s590_s11 = sshll.u32 %s673_s10, 4  ;;  %s591_s11 = int_to_ptr.vmem [resolvable:$false] %s590_s11 }
  0x3f   : > { %s592_s13 = scalar_lea.vmem %s591_s11, 2560  ;;  %p593_p11 = scmp.lt.s32.totalorder %s809_s12, %s591_s11 }
  0x40   : > { %p588_p0 = pnand %p586_p5, %p572_p6  ;;  %p594_p13 = scmp.lt.s32.totalorder %s592_s13, %s585_s7 }
  0x42   : > { %p589_p7 = pneg %p588_p0  ;;  %p595_p2 = por %p594_p13, %p593_p11 }
  0x44   : > { %p596_p3 = pnand %p595_p2, %p589_p7 }
  0x46   : > { %599 = shalt.err (!%p596_p3)
}
  0x47   : > { %s674_s14 = smov 512   ;;  %s675_s22 = smov 256  }
  0x48   : > { %s676_s5 = smov 16   ;;  %p936_p6 = scmp.ne.s32.totalorder %s931_s29, 0 }
  0x49   : > { %495 = dma.hbm_to_vmem [thread:$0]  (!%p935_p12), %s807_s20, 1280, %s809_s12, %s811_s6, %s674_s14, %s675_s22, %s676_s5  }
  0x4a   : > { %189 = sbr.rel (%p936_p6) target bundleno = 463 (0x1cf), region = 28  ;;  %s842_s9 = sand.u32 (!%p936_p6), 1, %s662_s16  }
  0x4b   : > { %s479_s23 = smul.u32 (!%p936_p6), 80, %s842_s9  ;;  %s192_s25 = scalar_lea.sflag (!%p936_p6), [#allocation3], %s842_s9 }
  0x4c   : > { %p937_p1 = scmp.ne.s32.totalorder (!%p936_p6), %s928_s26, 0 }
  0x4d   : > { %s195_s30 = scalar_lea.vmem (!%p936_p6), [#allocation2], %s479_s23 }
  0x51   : > { %645 = dma.done.wait (%p937_p1), %s192_s25, 1280  }
  0x52   : > { %647 = vsyncadd (%p937_p1), %s192_s25, 4294966016  ;;  %p938_p8 = scmp.eq.s32.totalorder %s726_s19, 0 }
  0x54   : > { %649 = dma.done.wait (%p938_p8), [#allocation6], 128   ;;  %p939_p12 = pmov %p938_p8 }
  0x55   : > { %v677_v0 = vmov 0.0   ;;  %v228_v1 = vld [vmem:[%s195_s30 + $0x8] sm:$0xff]  ;;  %v230_v2 = vld [vmem:[%s195_s30 + $0x18] sm:$0xff]  ;;  %v227_v3 = vld [vmem:[%s195_s30] sm:$0xff]  ;;  %vm241_vm0 = vcmask 1043456   ;;  %vm237_vm1 = vcmask 293888  }
  0x56   : > { %651 = vsyncadd (%p939_p12), [#allocation6], 4294967168  ;;  %312 = vmatprep.mubr.f32.mxu0 %v677_v0  ;;  %v470_v4 = vpack.c.bf16 %v230_v2, %v228_v1  ;;  %v229_v5 = vld [vmem:[%s195_s30 + $0x10] sm:$0xff]  ;;  %v232_v6 = vld [vmem:[%s195_s30 + $0x28] sm:$0xff]  ;;  %s458_s26 = sshll.u32 %s842_s9, 4  ;;  %p940_p4 = scmp.ne.s32.totalorder %s726_s19, 0 }
  0x57   : > { %v234_v7 = vld [vmem:[%s195_s30 + $0x38] sm:$0xff]  ;;  %v472_v8 = vpack.c.bf16 %v229_v5, %v227_v3  ;;  %v231_v10 = vld [vmem:[%s195_s30 + $0x20] sm:$0xff]  ;;  %v233_v11 = vld [vmem:[%s195_s30 + $0x30] sm:$0xff]  ;;  %s219_s29 = scalar_lea.vmem [#allocation7], %s458_s26  ;;  %vm325_vm2 = vcmask (!%p940_p4), 7168   ;;  %v678_v18 = vmov (!%p940_p4), 0.0  }
  0x58   : > { %v474_v9 = vpack.c.bf16 %v234_v7, %v232_v6  ;;  %471 = vmatprep.subr.bf16.mxu0 %v470_v4  ;;  %v476_v12 = vpack.c.bf16 %v233_v11, %v231_v10  ;;  %v236_v13 = vld [vmem:[%s195_s30 + $0x48] sm:$0xf]  ;;  %v235_v14 = vld [vmem:[%s195_s30 + $0x40] sm:$0xf]  ;;  %326 = vst.msk [vmem:[%s920_s3] sm:$0xff] (!%p940_p4), %vm325_vm2, %v678_v18  ;;  %327 = vst.msk [vmem:[%s921_s4] sm:$0xff] (!%p940_p4), %vm325_vm2, %v678_v18 }
  0x59   : > { %473 = vmatpush1.bf16.msra.mxu0 %v472_v8  ;;  %v226_v15 = vld [vmem:[#allocation5] sm:$0xff] }
  0x5a   : > { %475 = vmatprep.subr.bf16.mxu0 %v474_v9 }
  0x5d   : > { %477 = vmatpush1.bf16.msra.mxu0 %v476_v12 }
  0x5e   : > { %459 = vmatprep.subr.msk.mxu0 %vm241_vm0, %v236_v13 }
  0x61   : > { %460 = vmatpush1.msk.msra.mxu0 %vm241_vm0, %v235_v14 }
  0x62   : > { %461 = vmatmul.mubr.msk.f32.vlgmr.msra.gmra.mrb[0].mxu0 %vm237_vm1, %v226_v15 }
 0x131   : > { %324 = sbr.rel (%p940_p4) target bundleno = 312 (0x138), region = 40 }
 0x135   : > { %v314_v16 = vpop.f32.mrb[0].mxu0 }
 0x136   : > { %319 = vst [vmem:[%s219_s29] sm:$0xff] %v314_v16  ;;  %v316_v17 = vpop.f32.mrb[1].mxu0 }
 0x137   : > { %320 = vst [vmem:[%s219_s29 + $0x8] sm:$0xff] %v316_v17 }
 0x138 PF: > { %v329_v19 = vadd.f32 %v316_v17, %v314_v16  ;;  %v336_v20 = vmul.f32 %v314_v16, %v314_v16  ;;  %v337_v21 = vmul.f32 %v316_v17, %v316_v17  ;;  %s469_s7 = sshll.u32 %s726_s19, 8  ;;  %s358_s10 = sshll.u32 %s219_s29, 4  ;;  %s359_s10 = int_to_ptr.vmem [resolvable:$true] %s358_s10 }
 0x139   : > { %s867_s14 = scalar_lea.hbm %s919_s2, %s469_s7  ;;  %s344_s22 = scalar_lea.sflag [#allocation4], %s842_s9 }
 0x13a   : > { %330 = vadd.xlane.f32.xlu0 %v329_v19  ;;  %v338_v22 = vadd.f32 %v337_v21, %v336_v20  ;;  %s600_s5 = scalar_lea.vmem %s359_s10, 256  ;;  %p941_p10 = scmp.ne.s32.totalorder %s929_s27, 0 }
 0x13b   : > { %p601_p9 = scmp.ne.s32.totalorder %s359_s10, %s600_s5  ;;  %s679_s23 = smov [#allocation7]  }
 0x13c   : > { %s604_s25 = sshll.u32 %s679_s23, 4  ;;  %s605_s25 = int_to_ptr.vmem [resolvable:$false] %s604_s25 }
 0x13d   : > { %p602_p5 = pnand %p601_p9, %p941_p10  ;;  %s606_s30 = scalar_lea.vmem %s605_s25, 512 }
 0x13e   : > { %339 = vadd.xlane.f32.xlu0 %v338_v22  ;;  %p607_p7 = scmp.lt.s32.totalorder %s359_s10, %s605_s25  ;;  %p608_p11 = scmp.lt.s32.totalorder %s606_s30, %s600_s5 }
 0x13f   : > { %p603_p0 = pneg %p602_p5 }
 0x140   : > { %p609_p13 = por %p608_p11, %p607_p7 }
 0x142   : > { %p610_p2 = pnand %p609_p13, %p603_p0 }
 0x144   : > { %613 = shalt.err (!%p610_p2)
}
 0x145   : > { %s614_s19 = scalar_lea.hbm %s867_s14, 256  ;;  %s618_s29 = scalar_lea.hbm %s919_s2, 512 }
 0x146   : > { %p615_p3 = scmp.ne.s32.totalorder %s867_s14, %s614_s19  ;;  %p619_p8 = scmp.lt.u32.totalorder %s867_s14, %s919_s2 }
 0x147   : > { %p620_p12 = scmp.lt.u32.totalorder %s618_s29, %s614_s19  ;;  %p622_p9 = scmp.lt.u32.totalorder %s614_s19, %s867_s14 }
 0x148   : > { %p616_p6 = pnand %p615_p3, %p941_p10 }
 0x149   : > { %p621_p4 = por %p620_p12, %p619_p8 }
 0x14a   : > { %p617_p1 = pneg %p616_p6 }
 0x14b   : > { %p623_p5 = por %p622_p9, %p621_p4 }
 0x14d   : > { %p624_p0 = pnand %p623_p5, %p617_p1 }
 0x14f   : > { %627 = shalt.err (!%p624_p0)
}
 0x150   : > { %486 = dma.vmem_to_hbm [thread:$0]  (%p941_p10), %s359_s10, 256, %s867_s14, %s344_s22   ;;  %v328_v23 = vld [vmem:[%s920_s3] sm:$0xff]  ;;  %vm333_vm3 = vcmask 7168  }
 0x151   : > { %v335_v26 = vld [vmem:[%s921_s4] sm:$0xff] }
 0x1c7   : > { %v331_v24 = vpop.xlane.xlu0 %330 }
 0x1c8   : > { %v332_v25 = vadd.f32 %v331_v24, %v328_v23 }
 0x1ca   : > { %334 = vst.msk [vmem:[%s920_s3] sm:$0xff] %vm333_vm3, %v332_v25 }
 0x1cb   : > { %v340_v27 = vpop.xlane.xlu0 %339 }
 0x1cc   : > { %v341_v28 = vadd.f32 %v340_v27, %v335_v26 }
 0x1ce   : > { %342 = vst.msk [vmem:[%s921_s4] sm:$0xff] %vm333_vm3, %v341_v28 }
 0x1cf PF: > { %s382_s10 = sand.u32 1, %s658_s15   ;;  %p942_p10 = scmp.ne.s32.totalorder %s930_s28, 0 }
 0x1d0   : > { %p943_p7 = scmp.ge.s32.totalorder %s670_s18, 2  ;;  %s383_s14 = scalar_lea.sflag [#allocation4], %s382_s10 }
 0x1d2   : > { %p497_p11 = pnand %p943_p7, %p942_p10 }
 0x1d4   : > { %653 = dma.done.wait (!%p497_p11), %s383_s14, 256  }
 0x1d5   : > { %655 = vsyncadd (!%p497_p11), %s383_s14, 4294967040  ;;  %p19_p13 = scmp.ge.s32.totalorder %s730_s21, 4   ;;  %s944_s15 = smov %s662_s16 }
 0x1d6   : > { %s945_s16 = smov %s666_s17  ;;  %s946_s17 = smov %s742_s24 }
 0x1d7   : > { %s947_s18 = smov %s730_s21  ;;  %21 = sbr.rel (!%p19_p13) target bundleno = 6 (0x6), region = 97 }
 0x1de   :  { %388 = vsyncpa [#allocation3], 1 }
 0x1df   :  { %390 = vsyncpa [#allocation3 + $0x1], 1 }
 0x1e0   :  { %391 = vsyncpa [#allocation6], 1 }
 0x1e1   :  { %392 = vsyncpa [#allocation4], 1 }
 0x1e2   :  { %394 = vsyncpa [#allocation4 + $0x1], 1 }

</bundles_post_ra>
